<compile_context>
chip_gen: v7x
topology: tpu7x:2x2x1
jax: 0.10.0
libtpu: 0.0.40
codegen_flags: <defaults>
</compile_context>

<pallas_src>
import functools

import jax
import jax.numpy as jnp
from jax.experimental import pallas as pl
from jax.experimental.pallas import tpu as pltpu

LANE = 128      # vreg lane width (last dim)
SUBLANE = 8     # vreg sublane width for 32-bit dtypes (second-to-last dim)


def _round_up(n, m):
    return (n + m - 1) // m * m


def _vmem_budget_bytes():
    """~7/8 of this chip's physical VMEM (headroom for Mosaic internal scratch)."""
    try:
        cap = int(pltpu.get_tpu_info().vmem_capacity_bytes)
    except Exception:
        cap = 64 << 20  # conservative (v7x-sized) fallback
    return (cap * 7) // 8


def mlp_kernel(x_ref, w1_ref, b1_ref, w2_ref, b2_ref, o_ref):
    """Fused Linear -> bias -> ReLU -> (Dropout p=0) -> Linear -> bias.

    The (TM, Hp) hidden activation never leaves VMEM. Both matmuls accumulate in f32
    on the MXU; the elementwise epilogue (bias add / ReLU) stays in f32. The cast of
    x to the weight compute dtype happens here so x is read from HBM exactly once.
    """
    x = x_ref[...].astype(w1_ref.dtype)
    h = jnp.dot(x, w1_ref[...], preferred_element_type=jnp.float32)
    h = jnp.maximum(h + b1_ref[...], 0.0)
    # dropout_prob = 0.0 -> identity.
    # TODO(synk): dropout_prob > 0 would need pltpu.prng_seed / prng_random_bits.
    out = jnp.dot(h.astype(w2_ref.dtype), w2_ref[...],
                  preferred_element_type=jnp.float32)
    o_ref[...] = (out + b2_ref[...]).astype(o_ref.dtype)


def prepare_params(w1, b1, w2, b2, *, compute_dtype=jnp.float32):
    """One-time layout conversion (call at parameter-load time, NOT every forward).

    nn.Linear weights (out, in) -> row-major (in, out_padded) with H and C zero-padded
    to 128-lane multiples. Biases kept in f32 as (1, N) rows. Zero padding is exact:
    padded hidden units get h=0 (zero cols + zero bias) and padded classes get logit 0,
    which is sliced away after the kernel. bf16 compute_dtype is a valid fast path on
    v5e as well as v6e/v7x (f32 accumulation + f32 epilogue preserved).
    """
    H, D = w1.shape
    C = w2.shape[0]
    Hp = _round_up(H, LANE)
    Cp = _round_up(C, LANE)
    w1_t = jnp.zeros((D, Hp), compute_dtype).at[:, :H].set(w1.T.astype(compute_dtype))
    w2_t = jnp.zeros((Hp, Cp), compute_dtype).at[:H, :C].set(w2.T.astype(compute_dtype))
    b1_r = jnp.zeros((1, Hp), jnp.float32).at[:, :H].set(b1.astype(jnp.float32))
    b2_r = jnp.zeros((1, Cp), jnp.float32).at[:, :C].set(b2.astype(jnp.float32))
    return w1_t, b1_r, w2_t, b2_r


@functools.partial(
    jax.jit,
    static_argnames=("num_classes", "block_b", "out_dtype", "single_buffer_weights"))
def two_layer_mlp(x, w1_t, b1_r, w2_t, b2_r, *, num_classes, block_b=1024,
                  out_dtype=None, single_buffer_weights=True):
    """x: (B, D) -> logits (B, num_classes). Params come from prepare_params()."""
    B, D = x.shape
    Hp = w1_t.shape[1]
    Cp = w2_t.shape[1]
    cdt = w1_t.dtype                       # MXU compute dtype (f32 or bf16)
    if out_dtype is None:
        out_dtype = cdt                    # bf16 compute -> bf16 logits (halves writeback)

    x_bytes = jnp.dtype(x.dtype).itemsize
    w_bytes = jnp.dtype(cdt).itemsize
    o_bytes = jnp.dtype(out_dtype).itemsize

    # Sublane packing of the narrowest streamed dtype: 8 for f32, 16 for bf16, 32 for i8.
    pack = max(SUBLANE, 32 // min(x_bytes, w_bytes, o_bytes))

    # ---- batch tile: largest that fits the generation-aware VMEM budget ----
    w_bufs = 1 if single_buffer_weights else 2
    weight_bytes = w_bufs * ((D * Hp + Hp * Cp) * w_bytes + (Hp + Cp) * 4)

    def tile_bytes(tm):
        # double-buffered streamed x/out tiles + f32 hidden + f32 pre-store logits.
        return (2 * tm * D * x_bytes + 2 * tm * Cp * o_bytes
                + tm * Hp * 4 + tm * Cp * 4)

    vmem_cap = _vmem_budget_bytes()
    tile_budget = vmem_cap - weight_bytes

    # TM == B (any value) is a legal full-dim block; otherwise TM stays a `pack`
    # multiple (block_b already is) so the block's sublane dim satisfies (8,128).
    TM = min(block_b, B)
    while TM > pack and tile_bytes(TM) > tile_budget:
        TM = max(pack, ((TM // 2) // pack) * pack)
    # Ragged last tile is handled by Pallas boundary masking -> no jnp.pad pass over x.
    grid = (pl.cdiv(B, TM),)

    vmem_limit = int(min(max(weight_bytes + tile_bytes(TM) + (8 << 20), 32 << 20),
                         vmem_cap))

    cost = pl.CostEstimate(
        flops=2 * B * (D * Hp + Hp * Cp),
        transcendentals=0,
        bytes_accessed=(B * D * x_bytes + (D * Hp + Hp * Cp) * w_bytes
                        + (Hp + Cp) * 4 + B * Cp * o_bytes),
    )

    def resident_spec(shape):
        idx = lambda i: (0,) * len(shape)
        if single_buffer_weights:
            # Constant index_map -> block never changes; 1 buffer halves resident VMEM.
            return pl.BlockSpec(shape, idx, pipeline_mode=pl.Buffered(1))
        return pl.BlockSpec(shape, idx)

    out = pl.pallas_call(
        mlp_kernel,
        out_shape=jax.ShapeDtypeStruct((B, Cp), out_dtype),
        grid=grid,
        in_specs=[
            pl.BlockSpec((TM, D), lambda i: (i, 0)),   # x: streamed per batch tile
            resident_spec((D, Hp)),                    # w1: VMEM-resident
            resident_spec((1, Hp)),                    # b1: VMEM-resident
            resident_spec((Hp, Cp)),                   # w2: VMEM-resident
            resident_spec((1, Cp)),                    # b2: VMEM-resident
        ],
        out_specs=pl.BlockSpec((TM, Cp), lambda i: (i, 0)),  # lane-dense (Cp % 128 == 0)
        compiler_params=pltpu.CompilerParams(
            dimension_semantics=("parallel",),  # batch tiles shard across TCs (v7x)
            vmem_limit_bytes=vmem_limit,
        ),
        cost_estimate=cost,
    )(x, w1_t, b1_r, w2_t, b2_r)

    # Strip class padding outside the kernel (store is lane-dense inside).
    return out[:, :num_classes]


if __name__ == "__main__":
    # Small shapes consistent with the (B, D) -> (B, C) MLP forward
    # (hidden_dim=200 matches the module default; C=10 classes).
    B, D, H, C = 16, 64, 200, 10

    key = jax.random.PRNGKey(0)
    kx, kw1, kb1, kw2, kb2 = jax.random.split(key, 5)
    x = jax.random.normal(kx, (B, D), dtype=jnp.float32)
    # Deterministic synthetic params (nn.Linear-style shapes: weight (out, in)).
    w1 = jax.random.normal(kw1, (H, D), dtype=jnp.float32) * 0.1
    b1 = jax.random.normal(kb1, (H,), dtype=jnp.float32) * 0.1
    w2 = jax.random.normal(kw2, (C, H), dtype=jnp.float32) * 0.1
    b2 = jax.random.normal(kb2, (C,), dtype=jnp.float32) * 0.1

    # Reference in plain JAX (same math as the PyTorch forward, dropout p=0).
    ref = jnp.maximum(x @ w1.T + b1, 0.0) @ w2.T + b2

    # f32 path: tight tolerance. Probe pl.Buffered(1) support once; fall back to the
    # default (double-buffered resident weights) if this jax build rejects it.
    p32 = prepare_params(w1, b1, w2, b2, compute_dtype=jnp.float32)
    sbw = True
    try:
        out32 = jax.block_until_ready(
            two_layer_mlp(x, *p32, num_classes=C, single_buffer_weights=sbw))
    except Exception:
        sbw = False
        out32 = jax.block_until_ready(
            two_layer_mlp(x, *p32, num_classes=C, single_buffer_weights=sbw))
    assert out32.shape == (B, C) and out32.dtype == jnp.float32
    assert jnp.allclose(out32, ref, atol=1e-5, rtol=1e-5)

    # bf16 MXU path (f32 accumulation + epilogue, bf16 logits): valid on v5e/v6e/v7x.
    pbf = prepare_params(w1, b1, w2, b2, compute_dtype=jnp.bfloat16)
    outbf = jax.block_until_ready(
        two_layer_mlp(x, *pbf, num_classes=C, single_buffer_weights=sbw))
    assert outbf.shape == (B, C) and outbf.dtype == jnp.bfloat16
    assert jnp.allclose(outbf.astype(jnp.float32), ref, atol=5e-2, rtol=5e-2)

    # bf16 compute with explicit f32 logits (for callers that need f32 downstream).
    outbf32 = jax.block_until_ready(
        two_layer_mlp(x, *pbf, num_classes=C, out_dtype=jnp.float32,
                      single_buffer_weights=sbw))
    assert outbf32.shape == (B, C) and outbf32.dtype == jnp.float32
    assert jnp.allclose(outbf32, ref, atol=5e-2, rtol=5e-2)

    print("KERNEL_OK")
</pallas_src>

<mosaic_0001>
module attributes {stable_mosaic.version = 11 : i64} {
  func.func @mlp_kernel(%arg0: i32, %arg1: memref<16x64xf32, #tpu.memory_space<vmem>>, %arg2: memref<64x256xf32, #tpu.memory_space<vmem>>, %arg3: memref<1x256xf32, #tpu.memory_space<vmem>>, %arg4: memref<256x128xf32, #tpu.memory_space<vmem>>, %arg5: memref<1x128xf32, #tpu.memory_space<vmem>>, %arg6: memref<16x128xf32, #tpu.memory_space<vmem>>) attributes {dimension_semantics = [#tpu.dimension_semantics<parallel>], iteration_bounds = array<i64: 1>, scalar_prefetch = 0 : i64, scratch_operands = 0 : i64, tpu.core_type = #tpu.core_type<tc>, window_params = [{transform_indices = @transform_0, window_bounds = array<i64: 16, 64>}, {pipeline_mode = #tpu.pipeline_mode<synchronous>, transform_indices = @transform_1, window_bounds = array<i64: 64, 256>}, {pipeline_mode = #tpu.pipeline_mode<synchronous>, transform_indices = @transform_2, window_bounds = array<i64: 1, 256>}, {pipeline_mode = #tpu.pipeline_mode<synchronous>, transform_indices = @transform_3, window_bounds = array<i64: 256, 128>}, {pipeline_mode = #tpu.pipeline_mode<synchronous>, transform_indices = @transform_4, window_bounds = array<i64: 1, 128>}, {transform_indices = @transform_5, window_bounds = array<i64: 16, 128>}]} {
    %c0 = arith.constant 0 : index
    %c0_0 = arith.constant 0 : index
    %0 = vector.load %arg1[%c0, %c0_0] : memref<16x64xf32, #tpu.memory_space<vmem>>, vector<16x64xf32>
    %c0_1 = arith.constant 0 : index
    %c0_2 = arith.constant 0 : index
    %1 = vector.load %arg2[%c0_1, %c0_2] : memref<64x256xf32, #tpu.memory_space<vmem>>, vector<64x256xf32>
    %cst = arith.constant dense<0.000000e+00> : vector<16x256xf32>
    %2 = tpu.matmul %0, %1, %cst {dimension_numbers = #tpu.dot_dimension_numbers<[1], [0], [0], [1], [0, 0, 1, 1], [], []>} : vector<16x64xf32>, vector<64x256xf32>, vector<16x256xf32> -> vector<16x256xf32>
    %c0_3 = arith.constant 0 : index
    %c0_4 = arith.constant 0 : index
    %3 = vector.load %arg3[%c0_3, %c0_4] : memref<1x256xf32, #tpu.memory_space<vmem>>, vector<1x256xf32>
    %4 = vector.broadcast %3 : vector<1x256xf32> to vector<16x256xf32>
    %5 = arith.addf %2, %4 : vector<16x256xf32>
    %cst_5 = arith.constant 0.000000e+00 : f32
    %6 = vector.broadcast %cst_5 : f32 to vector<16x256xf32>
    %7 = arith.maximumf %5, %6 : vector<16x256xf32>
    %c0_6 = arith.constant 0 : index
    %c0_7 = arith.constant 0 : index
    %8 = vector.load %arg4[%c0_6, %c0_7] : memref<256x128xf32, #tpu.memory_space<vmem>>, vector<256x128xf32>
    %cst_8 = arith.constant dense<0.000000e+00> : vector<16x128xf32>
    %9 = tpu.matmul %7, %8, %cst_8 {dimension_numbers = #tpu.dot_dimension_numbers<[1], [0], [0], [1], [0, 0, 1, 1], [], []>} : vector<16x256xf32>, vector<256x128xf32>, vector<16x128xf32> -> vector<16x128xf32>
    %c0_9 = arith.constant 0 : index
    %c0_10 = arith.constant 0 : index
    %10 = vector.load %arg5[%c0_9, %c0_10] : memref<1x128xf32, #tpu.memory_space<vmem>>, vector<1x128xf32>
    %11 = vector.broadcast %10 : vector<1x128xf32> to vector<16x128xf32>
    %12 = arith.addf %9, %11 : vector<16x128xf32>
    %c0_11 = arith.constant 0 : index
    %c0_12 = arith.constant 0 : index
    %13 = vector.load %arg6[%c0_11, %c0_12] : memref<16x128xf32, #tpu.memory_space<vmem>>, vector<16x128xf32>
    tpu.vector_store %arg6[%c0_11, %c0_12], %12 {strides = array<i32>} : memref<16x128xf32, #tpu.memory_space<vmem>>, vector<16x128xf32>,
    return
  }
  func.func @transform_0(%arg0: i32) -> (i32, i32) {
    %c0_i32 = arith.constant 0 : i32
    %c0_i32_0 = arith.constant 0 : i32
    return %arg0, %c0_i32 : i32, i32
  }
  func.func @transform_1(%arg0: i32) -> (i32, i32) {
    %c0_i32 = arith.constant 0 : i32
    %c0_i32_0 = arith.constant 0 : i32
    %c0_i32_1 = arith.constant 0 : i32
    return %c0_i32, %c0_i32_0 : i32, i32
  }
  func.func @transform_2(%arg0: i32) -> (i32, i32) {
    %c0_i32 = arith.constant 0 : i32
    %c0_i32_0 = arith.constant 0 : i32
    %c0_i32_1 = arith.constant 0 : i32
    return %c0_i32, %c0_i32_0 : i32, i32
  }
  func.func @transform_3(%arg0: i32) -> (i32, i32) {
    %c0_i32 = arith.constant 0 : i32
    %c0_i32_0 = arith.constant 0 : i32
    %c0_i32_1 = arith.constant 0 : i32
    return %c0_i32, %c0_i32_0 : i32, i32
  }
  func.func @transform_4(%arg0: i32) -> (i32, i32) {
    %c0_i32 = arith.constant 0 : i32
    %c0_i32_0 = arith.constant 0 : i32
    %c0_i32_1 = arith.constant 0 : i32
    return %c0_i32, %c0_i32_0 : i32, i32
  }
  func.func @transform_5(%arg0: i32) -> (i32, i32) {
    %c0_i32 = arith.constant 0 : i32
    %c0_i32_0 = arith.constant 0 : i32
    return %arg0, %c0_i32 : i32, i32
  }
}

module attributes {stable_mosaic.version = 11 : i64} {
  func.func @mlp_kernel(%arg0: i32, %arg1: memref<16x64xf32, #tpu.memory_space<vmem>>, %arg2: memref<64x256xf32, #tpu.memory_space<vmem>>, %arg3: memref<1x256xf32, #tpu.memory_space<vmem>>, %arg4: memref<256x128xf32, #tpu.memory_space<vmem>>, %arg5: memref<1x128xf32, #tpu.memory_space<vmem>>, %arg6: memref<16x128xf32, #tpu.memory_space<vmem>>) attributes {dimension_semantics = [#tpu.dimension_semantics<parallel>], iteration_bounds = array<i64: 1>, scalar_prefetch = 0 : i64, scratch_operands = 0 : i64, tpu.core_type = #tpu.core_type<tc>, window_params = [{transform_indices = @transform_0, window_bounds = array<i64: 16, 64>}, {pipeline_mode = #tpu.pipeline_mode<synchronous>, transform_indices = @transform_1, window_bounds = array<i64: 64, 256>}, {pipeline_mode = #tpu.pipeline_mode<synchronous>, transform_indices = @transform_2, window_bounds = array<i64: 1, 256>}, {pipeline_mode = #tpu.pipeline_mode<synchronous>, transform_indices = @transform_3, window_bounds = array<i64: 256, 128>}, {pipeline_mode = #tpu.pipeline_mode<synchronous>, transform_indices = @transform_4, window_bounds = array<i64: 1, 128>}, {transform_indices = @transform_5, window_bounds = array<i64: 16, 128>}]} {
    %c0 = arith.constant 0 : index
    %c0_0 = arith.constant 0 : index
    %0 = vector.load %arg1[%c0, %c0_0] : memref<16x64xf32, #tpu.memory_space<vmem>>, vector<16x64xf32>
    %c0_1 = arith.constant 0 : index
    %c0_2 = arith.constant 0 : index
    %1 = vector.load %arg2[%c0_1, %c0_2] : memref<64x256xf32, #tpu.memory_space<vmem>>, vector<64x256xf32>
    %cst = arith.constant dense<0.000000e+00> : vector<16x256xf32>
    %2 = tpu.matmul %0, %1, %cst {dimension_numbers = #tpu.dot_dimension_numbers<[1], [0], [0], [1], [0, 0, 1, 1], [], []>} : vector<16x64xf32>, vector<64x256xf32>, vector<16x256xf32> -> vector<16x256xf32>
    %c0_3 = arith.constant 0 : index
    %c0_4 = arith.constant 0 : index
    %3 = vector.load %arg3[%c0_3, %c0_4] : memref<1x256xf32, #tpu.memory_space<vmem>>, vector<1x256xf32>
    %4 = vector.broadcast %3 : vector<1x256xf32> to vector<16x256xf32>
    %5 = arith.addf %2, %4 : vector<16x256xf32>
    %cst_5 = arith.constant 0.000000e+00 : f32
    %6 = vector.broadcast %cst_5 : f32 to vector<16x256xf32>
    %7 = arith.maximumf %5, %6 : vector<16x256xf32>
    %c0_6 = arith.constant 0 : index
    %c0_7 = arith.constant 0 : index
    %8 = vector.load %arg4[%c0_6, %c0_7] : memref<256x128xf32, #tpu.memory_space<vmem>>, vector<256x128xf32>
    %cst_8 = arith.constant dense<0.000000e+00> : vector<16x128xf32>
    %9 = tpu.matmul %7, %8, %cst_8 {dimension_numbers = #tpu.dot_dimension_numbers<[1], [0], [0], [1], [0, 0, 1, 1], [], []>} : vector<16x256xf32>, vector<256x128xf32>, vector<16x128xf32> -> vector<16x128xf32>
    %c0_9 = arith.constant 0 : index
    %c0_10 = arith.constant 0 : index
    %10 = vector.load %arg5[%c0_9, %c0_10] : memref<1x128xf32, #tpu.memory_space<vmem>>, vector<1x128xf32>
    %11 = vector.broadcast %10 : vector<1x128xf32> to vector<16x128xf32>
    %12 = arith.addf %9, %11 : vector<16x128xf32>
    %c0_11 = arith.constant 0 : index
    %c0_12 = arith.constant 0 : index
    %13 = vector.load %arg6[%c0_11, %c0_12] : memref<16x128xf32, #tpu.memory_space<vmem>>, vector<16x128xf32>
    tpu.vector_store %arg6[%c0_11, %c0_12], %12 {strides = array<i32>} : memref<16x128xf32, #tpu.memory_space<vmem>>, vector<16x128xf32>,
    return
  }
  func.func @transform_0(%arg0: i32) -> (i32, i32) {
    %c0_i32 = arith.constant 0 : i32
    %c0_i32_0 = arith.constant 0 : i32
    return %arg0, %c0_i32 : i32, i32
  }
  func.func @transform_1(%arg0: i32) -> (i32, i32) {
    %c0_i32 = arith.constant 0 : i32
    %c0_i32_0 = arith.constant 0 : i32
    %c0_i32_1 = arith.constant 0 : i32
    return %c0_i32, %c0_i32_0 : i32, i32
  }
  func.func @transform_2(%arg0: i32) -> (i32, i32) {
    %c0_i32 = arith.constant 0 : i32
    %c0_i32_0 = arith.constant 0 : i32
    %c0_i32_1 = arith.constant 0 : i32
    return %c0_i32, %c0_i32_0 : i32, i32
  }
  func.func @transform_3(%arg0: i32) -> (i32, i32) {
    %c0_i32 = arith.constant 0 : i32
    %c0_i32_0 = arith.constant 0 : i32
    %c0_i32_1 = arith.constant 0 : i32
    return %c0_i32, %c0_i32_0 : i32, i32
  }
  func.func @transform_4(%arg0: i32) -> (i32, i32) {
    %c0_i32 = arith.constant 0 : i32
    %c0_i32_0 = arith.constant 0 : i32
    %c0_i32_1 = arith.constant 0 : i32
    return %c0_i32, %c0_i32_0 : i32, i32
  }
  func.func @transform_5(%arg0: i32) -> (i32, i32) {
    %c0_i32 = arith.constant 0 : i32
    %c0_i32_0 = arith.constant 0 : i32
    return %arg0, %c0_i32 : i32, i32
  }
}

</mosaic_0001>

<bundles_post_ra>
// kernel: two_layer_mlp.1
= control target key start
LH: loop header
LB: loop body
LE: loop exit
PB: predicated region body
PF: predicated region fallthrough
CT: control target
= control target key end

     0   :  { %10 = vsyncpa [#allocation3], 0  ;;  %s612_s0 = inlined_call_operand.hbm [shape: f32[16,64], index: 0, kind: input, shape index: {}]   ;;  %s613_s1 = inlined_call_operand.hbm [shape: f32[64,256], index: 1, kind: input, shape index: {}]   ;;  %s614_s2 = inlined_call_operand.vmem [shape: f32[1,256], index: 2, kind: input, shape index: {}]   ;;  %s615_s3 = inlined_call_operand.hbm [shape: f32[256,128], index: 3, kind: input, shape index: {}]   ;;  %s616_s4 = inlined_call_operand.vmem [shape: f32[1,128], index: 4, kind: input, shape index: {}]   ;;  %s617_s5 = inlined_call_operand.hbm [shape: f32[16,128], index: 5, kind: output, shape index: {}]  }
   0x1   :  { %11 = vsyncpa [#allocation6], 0 }
   0x2   :  { %12 = vsyncpa [#allocation4], 0  ;;  %s506_s18 = smov [#allocation5]   ;;  %s412_s22 = scalar_lea.hbm %s613_s1, 2048 }
   0x3   :  { %s30_s19 = sshll.u32 %s506_s18, 4  ;;  %p413_p0 = scmp.ne.s32.totalorder %s613_s1, %s412_s22  ;;  %s31_s19 = int_to_ptr.vmem [resolvable:$true] %s30_s19 }
   0x4   :  { %p416_p1 = scmp.lt.u32.totalorder %s412_s22, %s613_s1 }
   0x6   :  { %p418_p2 = pnand %p416_p1, %p413_p0 }
   0x8   :  { %421 = shalt.err (!%p418_p2)
}
   0x9   :  { %s422_s27 = scalar_lea.vmem %s31_s19, 2048  ;;  %p427_p4 = scmp.lt.s32.totalorder %s31_s19, %s31_s19 }
   0xa   :  { %p423_p3 = scmp.ne.s32.totalorder %s31_s19, %s422_s27  ;;  %p428_p5 = scmp.lt.s32.totalorder %s422_s27, %s422_s27 }
   0xc   :  { %p429_p6 = por %p428_p5, %p427_p4 }
   0xe   :  { %p430_p7 = pnand %p429_p6, %p423_p3 }
  0x10   :  { %433 = shalt.err (!%p430_p7)
}
  0x11   :  { %s507_s28 = smov 256   ;;  %s508_s29 = smov 16  }
  0x12   :  { %36 = dma.hbm_to_vmem [thread:$0]  %s613_s1, 2048, %s31_s19, [#allocation6], %s507_s28, %s507_s28, %s508_s29  }
  0x13   :  { %s509_s7 = smov [#allocation2]   ;;  %s434_s11 = scalar_lea.hbm %s612_s0, 256 }
  0x14   :  { %s18_s8 = sshll.u32 %s509_s7, 4  ;;  %p435_p8 = scmp.ne.s32.totalorder %s612_s0, %s434_s11  ;;  %s19_s8 = int_to_ptr.vmem [resolvable:$true] %s18_s8 }
  0x15   :  { %p438_p9 = scmp.lt.u32.totalorder %s434_s11, %s612_s0 }
  0x17   :  { %p440_p10 = pnand %p438_p9, %p435_p8 }
  0x19   :  { %443 = shalt.err (!%p440_p10)
}
  0x1a   :  { %s444_s16 = scalar_lea.vmem %s19_s8, 256  ;;  %p449_p12 = scmp.lt.s32.totalorder %s19_s8, %s19_s8 }
  0x1b   :  { %p445_p11 = scmp.ne.s32.totalorder %s19_s8, %s444_s16  ;;  %p450_p13 = scmp.lt.s32.totalorder %s444_s16, %s444_s16 }
  0x1d   :  { %p451_p0 = por %p450_p13, %p449_p12 }
  0x1f   :  { %p452_p1 = pnand %p451_p0, %p445_p11 }
  0x21   :  { %455 = shalt.err (!%p452_p1)
}
  0x22   :  { %s510_s1 = smov 128   ;;  %s511_s17 = smov 8  }
  0x23   :  { %24 = dma.hbm_to_vmem [thread:$0]  %s612_s0, 256, %s19_s8, [#allocation3], %s510_s1, %s510_s1, %s511_s17  }
  0x24   :  { %s512_s20 = smov [#allocation7]   ;;  %s456_s24 = scalar_lea.hbm %s615_s3, 4096 }
  0x25   :  { %s44_s21 = sshll.u32 %s512_s20, 4  ;;  %p457_p2 = scmp.ne.s32.totalorder %s615_s3, %s456_s24  ;;  %s45_s21 = int_to_ptr.vmem [resolvable:$true] %s44_s21 }
  0x26   :  { %p460_p3 = scmp.lt.u32.totalorder %s456_s24, %s615_s3 }
  0x28   :  { %p462_p4 = pnand %p460_p3, %p457_p2 }
  0x2a   :  { %465 = shalt.err (!%p462_p4)
}
  0x2b   :  { %s466_s29 = scalar_lea.vmem %s45_s21, 4096  ;;  %p471_p6 = scmp.lt.s32.totalorder %s45_s21, %s45_s21 }
  0x2c   :  { %p467_p5 = scmp.ne.s32.totalorder %s45_s21, %s466_s29  ;;  %p472_p7 = scmp.lt.s32.totalorder %s466_s29, %s466_s29 }
  0x2e   :  { %p473_p8 = por %p472_p7, %p471_p6 }
  0x30   :  { %p474_p9 = pnand %p473_p8, %p467_p5 }
  0x32   :  { %477 = shalt.err (!%p474_p9)
}
  0x33   :  { %50 = dma.hbm_to_vmem [thread:$0]  %s615_s3, 4096, %s45_s21, [#allocation6], %s510_s1, %s510_s1, %s511_s17  }
  0x34   :  { %500 = dma.done.wait [#allocation3], 256  }
  0x35   :  { %501 = vsyncadd [#allocation3], 4294967040 }
  0x36   :  { %502 = dma.done.wait [#allocation6], 6144  }
  0x37   :  { %503 = vsyncadd [#allocation6], 4294961152  ;;  %v513_v0 = vmov 0.0   ;;  %v65_v1 = vld [vmem:[#allocation5 + $0x8] sm:$0xff]  ;;  %v67_v2 = vld [vmem:[#allocation5 + $0x18] sm:$0xff]  ;;  %vm92_vm0 = vcmask 523264  }
  0x38   :  { %163 = vmatprep.mubr.f32.mxu0 %v513_v0  ;;  %v64_v3 = vld [vmem:[#allocation5] sm:$0xff]  ;;  %v355_v4 = vpack.c.bf16 %v67_v2, %v65_v1  ;;  %v66_v5 = vld [vmem:[#allocation5 + $0x10] sm:$0xff]  ;;  %v69_v6 = vld [vmem:[#allocation5 + $0x28] sm:$0xff]  ;;  %s514_s8 = smov [#allocation8]  }
  0x39   :  { %v71_v7 = vld [vmem:[#allocation5 + $0x38] sm:$0xff]  ;;  %v357_v8 = vpack.c.bf16 %v66_v5, %v64_v3  ;;  %v68_v10 = vld [vmem:[#allocation5 + $0x20] sm:$0xff]  ;;  %v70_v11 = vld [vmem:[#allocation5 + $0x30] sm:$0xff]  ;;  %s301_s9 = sshll.u32 %s514_s8, 4  ;;  %s302_s9 = int_to_ptr.vmem [resolvable:$true] %s301_s9 }
  0x3a   :  { %v359_v9 = vpack.c.bf16 %v71_v7, %v69_v6  ;;  %v73_v12 = vld [vmem:[#allocation5 + $0x48] sm:$0xff]  ;;  %356 = vmatprep.subr.bf16.mxu0 %v355_v4  ;;  %v75_v13 = vld [vmem:[#allocation5 + $0x58] sm:$0xff]  ;;  %v361_v14 = vpack.c.bf16 %v70_v11, %v68_v10  ;;  %v72_v15 = vld [vmem:[#allocation5 + $0x40] sm:$0xff]  ;;  %v82_v11 = vlaneseq  ;;  %s478_s10 = scalar_lea.vmem %s302_s9, 256  ;;  %p483_p11 = scmp.lt.s32.totalorder %s302_s9, %s302_s9 }
  0x3b   :  { %358 = vmatpush1.bf16.msra.mxu0 %v357_v8  ;;  %v363_v16 = vpack.c.bf16 %v75_v13, %v73_v12  ;;  %v74_v17 = vld [vmem:[#allocation5 + $0x50] sm:$0xff]  ;;  %v77_v18 = vld [vmem:[#allocation5 + $0x68] sm:$0xff]  ;;  %v79_v19 = vld [vmem:[#allocation5 + $0x78] sm:$0xff]  ;;  %p479_p10 = scmp.ne.s32.totalorder %s302_s9, %s478_s10  ;;  %p484_p12 = scmp.lt.s32.totalorder %s478_s10, %s478_s10 }
  0x3c   :  { %360 = vmatprep.subr.bf16.mxu0 %v359_v9  ;;  %v196_v20 = vld [vmem:[#allocation7 + $0x80] sm:$0xff]  ;;  %v197_v21 = vld [vmem:[#allocation7 + $0x88] sm:$0xff]  ;;  %v198_v25 = vld [vmem:[#allocation7 + $0x90] sm:$0xff]  ;;  %v365_v27 = vpack.c.bf16 %v74_v17, %v72_v15  ;;  %v367_v33 = vpack.c.bf16 %v79_v19, %v77_v18  ;;  %v83_v12 = vshrl.u32 %v82_v11, 7 }
  0x3d   :  { %v180_v22 = vld [vmem:[#allocation7] sm:$0xff]  ;;  %v371_v23 = vpack.c.bf16 %v197_v21, %v196_v20  ;;  %v181_v24 = vld [vmem:[#allocation7 + $0x8] sm:$0xff]  ;;  %v199_v26 = vld [vmem:[#allocation7 + $0x98] sm:$0xff]  ;;  %p485_p13 = por %p484_p12, %p483_p11 }
  0x3e   :  { %v373_v28 = vpack.c.bf16 %v181_v24, %v180_v22  ;;  %v375_v29 = vpack.c.bf16 %v199_v26, %v198_v25  ;;  %v182_v30 = vld [vmem:[#allocation7 + $0x10] sm:$0xff]  ;;  %v183_v31 = vld [vmem:[#allocation7 + $0x18] sm:$0xff]  ;;  %v200_v32 = vld [vmem:[#allocation7 + $0xa0] sm:$0xff]  ;;  %v84_v13 = vsub.s32 0, %v83_v12  ;;  %v88_v15 = vsub.s32 1, %v83_v12 }
  0x3f   :  { %362 = vmatpush1.bf16.msra.mxu0 %v361_v14  ;;  %v76_v34 = vld [vmem:[#allocation5 + $0x60] sm:$0xff]  ;;  %v78_v35 = vld [vmem:[#allocation5 + $0x70] sm:$0xff]  ;;  %372 = vmatprep.subr.bf16.mxu1 %v371_v23  ;;  %v201_v36 = vld [vmem:[#allocation7 + $0xa8] sm:$0xff]  ;;  %v377_v37 = vpack.c.bf16 %v183_v31, %v182_v30  ;;  %p486_p0 = pnand %p485_p13, %p479_p10 }
  0x40   :  { %364 = vmatprep.subr.bf16.mxu0 %v363_v16  ;;  %374 = vmatpush3.bf16.msra.mxu1 %v373_v28  ;;  %v379_v38 = vpack.c.bf16 %v201_v36, %v200_v32  ;;  %v184_v39 = vld [vmem:[#allocation7 + $0x20] sm:$0xff]  ;;  %v185_v40 = vld [vmem:[#allocation7 + $0x28] sm:$0xff]  ;;  %v369_v41 = vpack.c.bf16 %v78_v35, %v76_v34  ;;  %v202_v42 = vld [vmem:[#allocation7 + $0xb0] sm:$0xff] }
  0x41   :  { %376 = vmatprep.subr.bf16.mxu1 %v375_v29  ;;  %v203_v43 = vld [vmem:[#allocation7 + $0xb8] sm:$0xff]  ;;  %v381_v44 = vpack.c.bf16 %v185_v40, %v184_v39  ;;  %v186_v46 = vld [vmem:[#allocation7 + $0x30] sm:$0xff]  ;;  %v204_v49 = vld [vmem:[#allocation7 + $0xc0] sm:$0xff] }
  0x42   :  { %v383_v45 = vpack.c.bf16 %v203_v43, %v202_v42  ;;  %v187_v47 = vld [vmem:[#allocation7 + $0x38] sm:$0xff]  ;;  %v62_v48 = vld [vmem:[#allocation2] sm:$0xff]  ;;  %v205_v50 = vld [vmem:[#allocation7 + $0xc8] sm:$0xff] }
  0x43   :  { %366 = vmatpush1.bf16.msra.mxu0 %v365_v27  ;;  %v385_v51 = vpack.c.bf16 %v187_v47, %v186_v46  ;;  %v387_v52 = vpack.c.bf16 %v205_v50, %v204_v49  ;;  %v188_v53 = vld [vmem:[#allocation7 + $0x40] sm:$0xff]  ;;  %v189_v54 = vld [vmem:[#allocation7 + $0x48] sm:$0xff]  ;;  %v63_v55 = vld [vmem:[#allocation2 + $0x8] sm:$0xff] }
  0x44   :  { %368 = vmatprep.subr.bf16.mxu0 %v367_v33  ;;  %378 = vmatpush3.bf16.msra.mxu1 %v377_v37  ;;  %v206_v56 = vld [vmem:[#allocation7 + $0xd0] sm:$0xff]  ;;  %v207_v57 = vld [vmem:[#allocation7 + $0xd8] sm:$0xff]  ;;  %v389_v58 = vpack.c.bf16 %v189_v54, %v188_v53  ;;  %v208_v62 = vld [vmem:[#allocation7 + $0xe0] sm:$0xff] }
  0x45   :  { %380 = vmatprep.subr.bf16.mxu1 %v379_v38  ;;  %v391_v59 = vpack.c.bf16 %v207_v57, %v206_v56  ;;  %v190_v60 = vld [vmem:[#allocation7 + $0x50] sm:$0xff]  ;;  %v191_v61 = vld [vmem:[#allocation7 + $0x58] sm:$0xff]  ;;  %v209_v63 = vld [vmem:[#allocation7 + $0xe8] sm:$0xff] }
  0x46   :  { %v393_v1 = vpack.c.bf16 %v191_v61, %v190_v60  ;;  %v395_v2 = vpack.c.bf16 %v209_v63, %v208_v62  ;;  %v193_v3 = vld [vmem:[#allocation7 + $0x68] sm:$0xff]  ;;  %v210_v5 = vld [vmem:[#allocation7 + $0xf0] sm:$0xff]  ;;  %v211_v6 = vld [vmem:[#allocation7 + $0xf8] sm:$0xff] }
  0x47   :  { %370 = vmatpush1.bf16.msra.mxu0 %v369_v41  ;;  %v399_v7 = vpack.c.bf16 %v211_v6, %v210_v5  ;;  %v194_v8 = vld [vmem:[#allocation7 + $0x70] sm:$0xff]  ;;  %v195_v9 = vld [vmem:[#allocation7 + $0x78] sm:$0xff] }
  0x48   :  { %382 = vmatpush3.bf16.msra.mxu1 %v381_v44  ;;  %v401_v10 = vpack.c.bf16 %v195_v9, %v194_v8  ;;  %v80_v14 = vld [vmem:[%s614_s2] sm:$0x3] }
  0x49   :  { %384 = vmatprep.subr.bf16.mxu1 %v383_v45  ;;  %v85_v16 = vrot.slane %v80_v14, %v84_v13  ;;  %v89_v17 = vrot.slane %v80_v14, %v88_v15  ;;  %v316_v31 = vld [vmem:[%s616_s4] ss:$0 sm:$0xff] }
  0x4a   :  { %314 = vmatmul.mubr.msk.f32.vlgmr.msra.gmra.mrb[0].mxu0 %vm92_vm0, %v62_v48 }
  0x4b   :  { %169 = vmatprep.mubr.f32.mxu0 %v513_v0  ;;  %v192_v0 = vld [vmem:[#allocation7 + $0x60] sm:$0xff] }
  0x4c   :  { %386 = vmatpush3.bf16.msra.mxu1 %v385_v51  ;;  %v397_v4 = vpack.c.bf16 %v193_v3, %v192_v0 }
  0x4d   :  { %388 = vmatprep.subr.bf16.mxu1 %v387_v52 }
  0x4e   :  { %315 = vmatmul.mubr.msk.f32.gmra.mrb[2].mxu0 %vm92_vm0, %v63_v55 }
  0x50   :  { %390 = vmatpush3.bf16.msra.mxu1 %v389_v58 }
  0x51   :  { %392 = vmatprep.subr.bf16.mxu1 %v391_v59 }
  0x54   :  { %394 = vmatpush3.bf16.msra.mxu1 %v393_v1 }
  0x55   :  { %396 = vmatprep.subr.bf16.mxu1 %v395_v2 }
  0x58   :  { %398 = vmatpush3.bf16.msra.mxu1 %v397_v4 }
  0x59   :  { %400 = vmatprep.subr.bf16.mxu1 %v399_v7 }
  0x5c   :  { %402 = vmatpush3.bf16.msra.mxu1 %v401_v10 }
 0x11d   :  { %v165_v18 = vpop.f32.mrb[0].mxu0 }
 0x11e   :  { %v166_v19 = vadd.f32 %v165_v18, %v85_v16  ;;  %v167_v20 = vpop.f32.mrb[1].mxu0 }
 0x11f   :  { %v168_v21 = vadd.f32 %v167_v20, %v89_v17 }
 0x120   :  { %v176_v24 = vmax.f32 %v166_v19, 0.0 }
 0x121   :  { %v171_v22 = vpop.f32.mrb[2].mxu0  ;;  %v177_v23 = vmax.f32 %v168_v21, 0.0 }
 0x122   :  { %v172_v25 = vadd.f32 %v171_v22, %v85_v16  ;;  %v173_v26 = vpop.f32.mrb[3].mxu0 }
 0x123   :  { %v174_v27 = vadd.f32 %v173_v26, %v89_v17  ;;  %283 = vmatprep.mubr.f32.mxu1 %v177_v23 }
 0x124   :  { %284 = vmatmul.mubr.f32.vlgmr.msra.gmra.mrb[0].mxu1 %v176_v24  ;;  %v178_v29 = vmax.f32 %v172_v25, 0.0 }
 0x125   :  { %v179_v28 = vmax.f32 %v174_v27, 0.0 }
 0x127   :  { %288 = vmatprep.mubr.f32.mxu1 %v179_v28 }
 0x128   :  { %289 = vmatmul.mubr.f32.gmra.mrb[2].mxu1 %v178_v29 }
 0x1f7   :  { %v349_v30 = vpop.f32.mrb[0].mxu1 }
 0x1f8   :  { %v350_v32 = vpop.f32.mrb[1].mxu1 }
 0x1f9   :  { %v351_v33 = vadd.f32 %v350_v32, %v349_v30 }
 0x1fb   :  { %v286_v34 = vadd.f32 %v351_v33, %v316_v31  ;;  %v352_v35 = vpop.f32.mrb[2].mxu1 }
 0x1fc   :  { %v353_v36 = vpop.f32.mrb[3].mxu1 }
 0x1fd   :  { %294 = vst [vmem:[#allocation8] sm:$0xff] %v286_v34  ;;  %v354_v37 = vadd.f32 %v353_v36, %v352_v35 }
 0x1ff   :  { %v291_v38 = vadd.f32 %v354_v37, %v316_v31 }
 0x201   :  { %295 = vst [vmem:[#allocation8 + $0x8] sm:$0xff] %v291_v38 }
 0x202   :  { %489 = shalt.err (!%p486_p0)
}
 0x203   :  { %s490_s12 = scalar_lea.hbm %s617_s5, 256 }
 0x204   :  { %p491_p1 = scmp.ne.s32.totalorder %s617_s5, %s490_s12  ;;  %p494_p2 = scmp.lt.u32.totalorder %s490_s12, %s617_s5 }
 0x206   :  { %p496_p3 = pnand %p494_p2, %p491_p1 }
 0x208   :  { %499 = shalt.err (!%p496_p3)
}
 0x209   :  { %307 = dma.vmem_to_hbm [thread:$0]  %s302_s9, 256, %s617_s5, [#allocation4], %s510_s1, %s510_s1, %s511_s17  }
 0x20a   :  { %504 = dma.done.wait [#allocation4], 256  }
 0x20b   :  { %505 = vsyncadd [#allocation4], 4294967040 }
 0x20c   :  { %311 = vsyncpa [#allocation3], 1 }
 0x20d   :  { %312 = vsyncpa [#allocation6], 1 }
 0x20e   :  { %313 = vsyncpa [#allocation4], 1 }

// kernel: two_layer_mlp.1
= control target key start
LH: loop header
LB: loop body
LE: loop exit
PB: predicated region body
PF: predicated region fallthrough
CT: control target
= control target key end

     0   :  { %10 = vsyncpa [#allocation3], 0  ;;  %s612_s0 = inlined_call_operand.hbm [shape: f32[16,64], index: 0, kind: input, shape index: {}]   ;;  %s613_s1 = inlined_call_operand.hbm [shape: f32[64,256], index: 1, kind: input, shape index: {}]   ;;  %s614_s2 = inlined_call_operand.vmem [shape: f32[1,256], index: 2, kind: input, shape index: {}]   ;;  %s615_s3 = inlined_call_operand.hbm [shape: f32[256,128], index: 3, kind: input, shape index: {}]   ;;  %s616_s4 = inlined_call_operand.vmem [shape: f32[1,128], index: 4, kind: input, shape index: {}]   ;;  %s617_s5 = inlined_call_operand.hbm [shape: f32[16,128], index: 5, kind: output, shape index: {}]  }
   0x1   :  { %11 = vsyncpa [#allocation6], 0 }
   0x2   :  { %12 = vsyncpa [#allocation4], 0  ;;  %s506_s18 = smov [#allocation5]   ;;  %s412_s22 = scalar_lea.hbm %s613_s1, 2048 }
   0x3   :  { %s30_s19 = sshll.u32 %s506_s18, 4  ;;  %p413_p0 = scmp.ne.s32.totalorder %s613_s1, %s412_s22  ;;  %s31_s19 = int_to_ptr.vmem [resolvable:$true] %s30_s19 }
   0x4   :  { %p416_p1 = scmp.lt.u32.totalorder %s412_s22, %s613_s1 }
   0x6   :  { %p418_p2 = pnand %p416_p1, %p413_p0 }
   0x8   :  { %421 = shalt.err (!%p418_p2)
}
   0x9   :  { %s422_s27 = scalar_lea.vmem %s31_s19, 2048  ;;  %p427_p4 = scmp.lt.s32.totalorder %s31_s19, %s31_s19 }
   0xa   :  { %p423_p3 = scmp.ne.s32.totalorder %s31_s19, %s422_s27  ;;  %p428_p5 = scmp.lt.s32.totalorder %s422_s27, %s422_s27 }
   0xc   :  { %p429_p6 = por %p428_p5, %p427_p4 }
   0xe   :  { %p430_p7 = pnand %p429_p6, %p423_p3 }
  0x10   :  { %433 = shalt.err (!%p430_p7)
}
  0x11   :  { %s507_s28 = smov 256   ;;  %s508_s29 = smov 16  }
  0x12   :  { %36 = dma.hbm_to_vmem [thread:$0]  %s613_s1, 2048, %s31_s19, [#allocation6], %s507_s28, %s507_s28, %s508_s29  }
  0x13   :  { %s509_s7 = smov [#allocation2]   ;;  %s434_s11 = scalar_lea.hbm %s612_s0, 256 }
  0x14   :  { %s18_s8 = sshll.u32 %s509_s7, 4  ;;  %p435_p8 = scmp.ne.s32.totalorder %s612_s0, %s434_s11  ;;  %s19_s8 = int_to_ptr.vmem [resolvable:$true] %s18_s8 }
  0x15   :  { %p438_p9 = scmp.lt.u32.totalorder %s434_s11, %s612_s0 }
  0x17   :  { %p440_p10 = pnand %p438_p9, %p435_p8 }
  0x19   :  { %443 = shalt.err (!%p440_p10)
}
  0x1a   :  { %s444_s16 = scalar_lea.vmem %s19_s8, 256  ;;  %p449_p12 = scmp.lt.s32.totalorder %s19_s8, %s19_s8 }
  0x1b   :  { %p445_p11 = scmp.ne.s32.totalorder %s19_s8, %s444_s16  ;;  %p450_p13 = scmp.lt.s32.totalorder %s444_s16, %s444_s16 }
  0x1d   :  { %p451_p0 = por %p450_p13, %p449_p12 }
  0x1f   :  { %p452_p1 = pnand %p451_p0, %p445_p11 }
  0x21   :  { %455 = shalt.err (!%p452_p1)
}
  0x22   :  { %s510_s1 = smov 128   ;;  %s511_s17 = smov 8  }
  0x23   :  { %24 = dma.hbm_to_vmem [thread:$0]  %s612_s0, 256, %s19_s8, [#allocation3], %s510_s1, %s510_s1, %s511_s17  }
  0x24   :  { %s512_s20 = smov [#allocation7]   ;;  %s456_s24 = scalar_lea.hbm %s615_s3, 4096 }
  0x25   :  { %s44_s21 = sshll.u32 %s512_s20, 4  ;;  %p457_p2 = scmp.ne.s32.totalorder %s615_s3, %s456_s24  ;;  %s45_s21 = int_to_ptr.vmem [resolvable:$true] %s44_s21 }
  0x26   :  { %p460_p3 = scmp.lt.u32.totalorder %s456_s24, %s615_s3 }
  0x28   :  { %p462_p4 = pnand %p460_p3, %p457_p2 }
  0x2a   :  { %465 = shalt.err (!%p462_p4)
}
  0x2b   :  { %s466_s29 = scalar_lea.vmem %s45_s21, 4096  ;;  %p471_p6 = scmp.lt.s32.totalorder %s45_s21, %s45_s21 }
  0x2c   :  { %p467_p5 = scmp.ne.s32.totalorder %s45_s21, %s466_s29  ;;  %p472_p7 = scmp.lt.s32.totalorder %s466_s29, %s466_s29 }
  0x2e   :  { %p473_p8 = por %p472_p7, %p471_p6 }
  0x30   :  { %p474_p9 = pnand %p473_p8, %p467_p5 }
  0x32   :  { %477 = shalt.err (!%p474_p9)
}
  0x33   :  { %50 = dma.hbm_to_vmem [thread:$0]  %s615_s3, 4096, %s45_s21, [#allocation6], %s510_s1, %s510_s1, %s511_s17  }
  0x34   :  { %500 = dma.done.wait [#allocation3], 256  }
  0x35   :  { %501 = vsyncadd [#allocation3], 4294967040 }
  0x36   :  { %502 = dma.done.wait [#allocation6], 6144  }
  0x37   :  { %503 = vsyncadd [#allocation6], 4294961152  ;;  %v513_v0 = vmov 0.0   ;;  %v65_v1 = vld [vmem:[#allocation5 + $0x8] sm:$0xff]  ;;  %v67_v2 = vld [vmem:[#allocation5 + $0x18] sm:$0xff]  ;;  %vm92_vm0 = vcmask 523264  }
  0x38   :  { %163 = vmatprep.mubr.f32.mxu0 %v513_v0  ;;  %v64_v3 = vld [vmem:[#allocation5] sm:$0xff]  ;;  %v355_v4 = vpack.c.bf16 %v67_v2, %v65_v1  ;;  %v66_v5 = vld [vmem:[#allocation5 + $0x10] sm:$0xff]  ;;  %v69_v6 = vld [vmem:[#allocation5 + $0x28] sm:$0xff]  ;;  %s514_s8 = smov [#allocation8]  }
  0x39   :  { %v71_v7 = vld [vmem:[#allocation5 + $0x38] sm:$0xff]  ;;  %v357_v8 = vpack.c.bf16 %v66_v5, %v64_v3  ;;  %v68_v10 = vld [vmem:[#allocation5 + $0x20] sm:$0xff]  ;;  %v70_v11 = vld [vmem:[#allocation5 + $0x30] sm:$0xff]  ;;  %s301_s9 = sshll.u32 %s514_s8, 4  ;;  %s302_s9 = int_to_ptr.vmem [resolvable:$true] %s301_s9 }
  0x3a   :  { %v359_v9 = vpack.c.bf16 %v71_v7, %v69_v6  ;;  %v73_v12 = vld [vmem:[#allocation5 + $0x48] sm:$0xff]  ;;  %356 = vmatprep.subr.bf16.mxu0 %v355_v4  ;;  %v75_v13 = vld [vmem:[#allocation5 + $0x58] sm:$0xff]  ;;  %v361_v14 = vpack.c.bf16 %v70_v11, %v68_v10  ;;  %v72_v15 = vld [vmem:[#allocation5 + $0x40] sm:$0xff]  ;;  %v82_v11 = vlaneseq  ;;  %s478_s10 = scalar_lea.vmem %s302_s9, 256  ;;  %p483_p11 = scmp.lt.s32.totalorder %s302_s9, %s302_s9 }
  0x3b   :  { %358 = vmatpush1.bf16.msra.mxu0 %v357_v8  ;;  %v363_v16 = vpack.c.bf16 %v75_v13, %v73_v12  ;;  %v74_v17 = vld [vmem:[#allocation5 + $0x50] sm:$0xff]  ;;  %v77_v18 = vld [vmem:[#allocation5 + $0x68] sm:$0xff]  ;;  %v79_v19 = vld [vmem:[#allocation5 + $0x78] sm:$0xff]  ;;  %p479_p10 = scmp.ne.s32.totalorder %s302_s9, %s478_s10  ;;  %p484_p12 = scmp.lt.s32.totalorder %s478_s10, %s478_s10 }
  0x3c   :  { %360 = vmatprep.subr.bf16.mxu0 %v359_v9  ;;  %v196_v20 = vld [vmem:[#allocation7 + $0x80] sm:$0xff]  ;;  %v197_v21 = vld [vmem:[#allocation7 + $0x88] sm:$0xff]  ;;  %v198_v25 = vld [vmem:[#allocation7 + $0x90] sm:$0xff]  ;;  %v365_v27 = vpack.c.bf16 %v74_v17, %v72_v15  ;;  %v367_v33 = vpack.c.bf16 %v79_v19, %v77_v18  ;;  %v83_v12 = vshrl.u32 %v82_v11, 7 }
  0x3d   :  { %v180_v22 = vld [vmem:[#allocation7] sm:$0xff]  ;;  %v371_v23 = vpack.c.bf16 %v197_v21, %v196_v20  ;;  %v181_v24 = vld [vmem:[#allocation7 + $0x8] sm:$0xff]  ;;  %v199_v26 = vld [vmem:[#allocation7 + $0x98] sm:$0xff]  ;;  %p485_p13 = por %p484_p12, %p483_p11 }
  0x3e   :  { %v373_v28 = vpack.c.bf16 %v181_v24, %v180_v22  ;;  %v375_v29 = vpack.c.bf16 %v199_v26, %v198_v25  ;;  %v182_v30 = vld [vmem:[#allocation7 + $0x10] sm:$0xff]  ;;  %v183_v31 = vld [vmem:[#allocation7 + $0x18] sm:$0xff]  ;;  %v200_v32 = vld [vmem:[#allocation7 + $0xa0] sm:$0xff]  ;;  %v84_v13 = vsub.s32 0, %v83_v12  ;;  %v88_v15 = vsub.s32 1, %v83_v12 }
  0x3f   :  { %362 = vmatpush1.bf16.msra.mxu0 %v361_v14  ;;  %v76_v34 = vld [vmem:[#allocation5 + $0x60] sm:$0xff]  ;;  %v78_v35 = vld [vmem:[#allocation5 + $0x70] sm:$0xff]  ;;  %372 = vmatprep.subr.bf16.mxu1 %v371_v23  ;;  %v201_v36 = vld [vmem:[#allocation7 + $0xa8] sm:$0xff]  ;;  %v377_v37 = vpack.c.bf16 %v183_v31, %v182_v30  ;;  %p486_p0 = pnand %p485_p13, %p479_p10 }
  0x40   :  { %364 = vmatprep.subr.bf16.mxu0 %v363_v16  ;;  %374 = vmatpush3.bf16.msra.mxu1 %v373_v28  ;;  %v379_v38 = vpack.c.bf16 %v201_v36, %v200_v32  ;;  %v184_v39 = vld [vmem:[#allocation7 + $0x20] sm:$0xff]  ;;  %v185_v40 = vld [vmem:[#allocation7 + $0x28] sm:$0xff]  ;;  %v369_v41 = vpack.c.bf16 %v78_v35, %v76_v34  ;;  %v202_v42 = vld [vmem:[#allocation7 + $0xb0] sm:$0xff] }
  0x41   :  { %376 = vmatprep.subr.bf16.mxu1 %v375_v29  ;;  %v203_v43 = vld [vmem:[#allocation7 + $0xb8] sm:$0xff]  ;;  %v381_v44 = vpack.c.bf16 %v185_v40, %v184_v39  ;;  %v186_v46 = vld [vmem:[#allocation7 + $0x30] sm:$0xff]  ;;  %v204_v49 = vld [vmem:[#allocation7 + $0xc0] sm:$0xff] }
  0x42   :  { %v383_v45 = vpack.c.bf16 %v203_v43, %v202_v42  ;;  %v187_v47 = vld [vmem:[#allocation7 + $0x38] sm:$0xff]  ;;  %v62_v48 = vld [vmem:[#allocation2] sm:$0xff]  ;;  %v205_v50 = vld [vmem:[#allocation7 + $0xc8] sm:$0xff] }
  0x43   :  { %366 = vmatpush1.bf16.msra.mxu0 %v365_v27  ;;  %v385_v51 = vpack.c.bf16 %v187_v47, %v186_v46  ;;  %v387_v52 = vpack.c.bf16 %v205_v50, %v204_v49  ;;  %v188_v53 = vld [vmem:[#allocation7 + $0x40] sm:$0xff]  ;;  %v189_v54 = vld [vmem:[#allocation7 + $0x48] sm:$0xff]  ;;  %v63_v55 = vld [vmem:[#allocation2 + $0x8] sm:$0xff] }
  0x44   :  { %368 = vmatprep.subr.bf16.mxu0 %v367_v33  ;;  %378 = vmatpush3.bf16.msra.mxu1 %v377_v37  ;;  %v206_v56 = vld [vmem:[#allocation7 + $0xd0] sm:$0xff]  ;;  %v207_v57 = vld [vmem:[#allocation7 + $0xd8] sm:$0xff]  ;;  %v389_v58 = vpack.c.bf16 %v189_v54, %v188_v53  ;;  %v208_v62 = vld [vmem:[#allocation7 + $0xe0] sm:$0xff] }
  0x45   :  { %380 = vmatprep.subr.bf16.mxu1 %v379_v38  ;;  %v391_v59 = vpack.c.bf16 %v207_v57, %v206_v56  ;;  %v190_v60 = vld [vmem:[#allocation7 + $0x50] sm:$0xff]  ;;  %v191_v61 = vld [vmem:[#allocation7 + $0x58] sm:$0xff]  ;;  %v209_v63 = vld [vmem:[#allocation7 + $0xe8] sm:$0xff] }
  0x46   :  { %v393_v1 = vpack.c.bf16 %v191_v61, %v190_v60  ;;  %v395_v2 = vpack.c.bf16 %v209_v63, %v208_v62  ;;  %v193_v3 = vld [vmem:[#allocation7 + $0x68] sm:$0xff]  ;;  %v210_v5 = vld [vmem:[#allocation7 + $0xf0] sm:$0xff]  ;;  %v211_v6 = vld [vmem:[#allocation7 + $0xf8] sm:$0xff] }
  0x47   :  { %370 = vmatpush1.bf16.msra.mxu0 %v369_v41  ;;  %v399_v7 = vpack.c.bf16 %v211_v6, %v210_v5  ;;  %v194_v8 = vld [vmem:[#allocation7 + $0x70] sm:$0xff]  ;;  %v195_v9 = vld [vmem:[#allocation7 + $0x78] sm:$0xff] }
  0x48   :  { %382 = vmatpush3.bf16.msra.mxu1 %v381_v44  ;;  %v401_v10 = vpack.c.bf16 %v195_v9, %v194_v8  ;;  %v80_v14 = vld [vmem:[%s614_s2] sm:$0x3] }
  0x49   :  { %384 = vmatprep.subr.bf16.mxu1 %v383_v45  ;;  %v85_v16 = vrot.slane %v80_v14, %v84_v13  ;;  %v89_v17 = vrot.slane %v80_v14, %v88_v15  ;;  %v316_v31 = vld [vmem:[%s616_s4] ss:$0 sm:$0xff] }
  0x4a   :  { %314 = vmatmul.mubr.msk.f32.vlgmr.msra.gmra.mrb[0].mxu0 %vm92_vm0, %v62_v48 }
  0x4b   :  { %169 = vmatprep.mubr.f32.mxu0 %v513_v0  ;;  %v192_v0 = vld [vmem:[#allocation7 + $0x60] sm:$0xff] }
  0x4c   :  { %386 = vmatpush3.bf16.msra.mxu1 %v385_v51  ;;  %v397_v4 = vpack.c.bf16 %v193_v3, %v192_v0 }
  0x4d   :  { %388 = vmatprep.subr.bf16.mxu1 %v387_v52 }
  0x4e   :  { %315 = vmatmul.mubr.msk.f32.gmra.mrb[2].mxu0 %vm92_vm0, %v63_v55 }
  0x50   :  { %390 = vmatpush3.bf16.msra.mxu1 %v389_v58 }
  0x51   :  { %392 = vmatprep.subr.bf16.mxu1 %v391_v59 }
  0x54   :  { %394 = vmatpush3.bf16.msra.mxu1 %v393_v1 }
  0x55   :  { %396 = vmatprep.subr.bf16.mxu1 %v395_v2 }
  0x58   :  { %398 = vmatpush3.bf16.msra.mxu1 %v397_v4 }
  0x59   :  { %400 = vmatprep.subr.bf16.mxu1 %v399_v7 }
  0x5c   :  { %402 = vmatpush3.bf16.msra.mxu1 %v401_v10 }
 0x11d   :  { %v165_v18 = vpop.f32.mrb[0].mxu0 }
 0x11e   :  { %v166_v19 = vadd.f32 %v165_v18, %v85_v16  ;;  %v167_v20 = vpop.f32.mrb[1].mxu0 }
 0x11f   :  { %v168_v21 = vadd.f32 %v167_v20, %v89_v17 }
 0x120   :  { %v176_v24 = vmax.f32 %v166_v19, 0.0 }
 0x121   :  { %v171_v22 = vpop.f32.mrb[2].mxu0  ;;  %v177_v23 = vmax.f32 %v168_v21, 0.0 }
 0x122   :  { %v172_v25 = vadd.f32 %v171_v22, %v85_v16  ;;  %v173_v26 = vpop.f32.mrb[3].mxu0 }
 0x123   :  { %v174_v27 = vadd.f32 %v173_v26, %v89_v17  ;;  %283 = vmatprep.mubr.f32.mxu1 %v177_v23 }
 0x124   :  { %284 = vmatmul.mubr.f32.vlgmr.msra.gmra.mrb[0].mxu1 %v176_v24  ;;  %v178_v29 = vmax.f32 %v172_v25, 0.0 }
 0x125   :  { %v179_v28 = vmax.f32 %v174_v27, 0.0 }
 0x127   :  { %288 = vmatprep.mubr.f32.mxu1 %v179_v28 }
 0x128   :  { %289 = vmatmul.mubr.f32.gmra.mrb[2].mxu1 %v178_v29 }
 0x1f7   :  { %v349_v30 = vpop.f32.mrb[0].mxu1 }
 0x1f8   :  { %v350_v32 = vpop.f32.mrb[1].mxu1 }
 0x1f9   :  { %v351_v33 = vadd.f32 %v350_v32, %v349_v30 }
 0x1fb   :  { %v286_v34 = vadd.f32 %v351_v33, %v316_v31  ;;  %v352_v35 = vpop.f32.mrb[2].mxu1 }
 0x1fc   :  { %v353_v36 = vpop.f32.mrb[3].mxu1 }
 0x1fd   :  { %294 = vst [vmem:[#allocation8] sm:$0xff] %v286_v34  ;;  %v354_v37 = vadd.f32 %v353_v36, %v352_v35 }
 0x1ff   :  { %v291_v38 = vadd.f32 %v354_v37, %v316_v31 }
 0x201   :  { %295 = vst [vmem:[#allocation8 + $0x8] sm:$0xff] %v291_v38 }
 0x202   :  { %489 = shalt.err (!%p486_p0)
}
 0x203   :  { %s490_s12 = scalar_lea.hbm %s617_s5, 256 }
 0x204   :  { %p491_p1 = scmp.ne.s32.totalorder %s617_s5, %s490_s12  ;;  %p494_p2 = scmp.lt.u32.totalorder %s490_s12, %s617_s5 }
 0x206   :  { %p496_p3 = pnand %p494_p2, %p491_p1 }
 0x208   :  { %499 = shalt.err (!%p496_p3)
}
 0x209   :  { %307 = dma.vmem_to_hbm [thread:$0]  %s302_s9, 256, %s617_s5, [#allocation4], %s510_s1, %s510_s1, %s511_s17  }
 0x20a   :  { %504 = dma.done.wait [#allocation4], 256  }
 0x20b   :  { %505 = vsyncadd [#allocation4], 4294967040 }
 0x20c   :  { %311 = vsyncpa [#allocation3], 1 }
 0x20d   :  { %312 = vsyncpa [#allocation6], 1 }
 0x20e   :  { %313 = vsyncpa [#allocation4], 1 }

</bundles_post_ra>
